<compile_context>
chip_gen: v7x
topology: tpu7x:2x2x1
jax: 0.10.0
libtpu: 0.0.40
codegen_flags: <defaults>
</compile_context>

<pallas_src>
import jax
import jax.numpy as jnp
from jax.experimental import pallas as pl
from jax.experimental.pallas import tpu as pltpu


# ---------------------------------------------------------------------------
# Hardware-aware sizing helpers.
# ---------------------------------------------------------------------------
_FALLBACK_VMEM_BYTES = 64 * 2 ** 20   # v7x per-TensorCore VMEM (smallest in fleet)


def _vmem_capacity_bytes():
    """Physical VMEM per TensorCore (v5e/v6e: 128 MiB, v7x: 64 MiB)."""
    try:
        info = pltpu.get_tpu_info()
        cap = int(getattr(info, "vmem_capacity_bytes", 0) or 0)
        if cap > 0:
            return cap
    except Exception:
        pass
    return _FALLBACK_VMEM_BYTES


def _pick_class_block(n_cls, target):
    """Largest divisor of n_cls that is <= target (>= 1)."""
    c = max(1, min(int(target), n_cls))
    while n_cls % c:
        c -= 1
    return c


# ---------------------------------------------------------------------------
# Path 1: blocked concat (drop-in replacement for forward(); first call /
# fallback). Production callers should switch to Path 2 afterwards.
# ---------------------------------------------------------------------------
def _make_concat_kernel(n_ctx, n_suffix):
    def kernel(ctx_ref, prefix_ref, suffix_ref, out_ref, ctx_bcast, sems):
        # ctx_ref:    (n_ctx, D)         VMEM-resident (constant index_map)
        # prefix_ref: (C, 1, D)          this block's SOS rows
        # suffix_ref: (C, n_suffix, D)   this block's class-name/EOS rows
        # out_ref:    (C, seq, D)        this block's output
        # ctx_bcast:  (C, n_ctx, D)      scratch
        #
        # Broadcast the shared ctx across this block's classes (VMEM vreg
        # stores; hidden under the HBM-bound block DMAs).
        ctx_bcast[...] = jnp.broadcast_to(ctx_ref[...][None, :, :],
                                          ctx_bcast.shape)
        # Assemble the output block with three region DMAs instead of a vreg
        # concatenate: the row boundaries at 1 and 1 + n_ctx are in general
        # sublane-misaligned (e.g. seq=77), and a vreg concat would force XLU
        # relayouts + masked tail stores. The three copies overlap each other.
        cp_pre = pltpu.make_async_copy(
            prefix_ref, out_ref.at[:, pl.ds(0, 1), :], sems.at[0])
        cp_ctx = pltpu.make_async_copy(
            ctx_bcast, out_ref.at[:, pl.ds(1, n_ctx), :], sems.at[1])
        cp_suf = pltpu.make_async_copy(
            suffix_ref, out_ref.at[:, pl.ds(1 + n_ctx, n_suffix), :], sems.at[2])
        cp_pre.start()
        cp_ctx.start()
        cp_suf.start()
        cp_pre.wait()
        cp_ctx.wait()
        cp_suf.wait()
    return kernel


def prompt_learner_forward(ctx, token_prefix, token_suffix, *, cls_block=None):
    """Pallas implementation of PromptLearner.forward() ('end' position).

    ctx:          (n_ctx, ctx_dim)
    token_prefix: (n_cls, 1, ctx_dim)
    token_suffix: (n_cls, n_suffix, ctx_dim)
    returns:      (n_cls, 1 + n_ctx + n_suffix, ctx_dim)
    """
    n_ctx, ctx_dim = ctx.shape
    n_cls = token_prefix.shape[0]
    n_suffix = token_suffix.shape[1]
    seq = 1 + n_ctx + n_suffix
    assert token_prefix.shape == (n_cls, 1, ctx_dim)
    assert token_suffix.shape == (n_cls, n_suffix, ctx_dim)

    # Keep the frozen-embedding dtype (matches torch.cat in the module);
    # never upcast the (possibly bf16) buffers -- cast only the learned ctx.
    out_dtype = token_prefix.dtype
    ctx = ctx.astype(out_dtype)
    token_suffix = token_suffix.astype(out_dtype)
    itemsize = jnp.dtype(out_dtype).itemsize

    # --- size the class block from the per-chip VMEM budget ----------------
    # Working set/step: double-buffered (prefix + suffix + out) blocks + the
    # resident ctx + the broadcast scratch.
    cap = _vmem_capacity_bytes()
    budget = int(cap * 0.8)          # ~51 MiB on v7x (64), ~102 MiB on v5e/v6e (128)
    ctx_bytes = n_ctx * ctx_dim * itemsize
    per_class = itemsize * ctx_dim * (2 * (1 + n_suffix + seq) + n_ctx)
    auto_block = max(1, (budget - 2 * ctx_bytes) // per_class)
    if cls_block is None:
        cls_block = auto_block
    cls_block = max(1, min(int(cls_block), n_cls))

    # No jnp.pad remainder path (it re-copies prefix/suffix and the output in
    # HBM every forward). Prefer a divisor of n_cls; only if the best divisor
    # is degenerate (e.g. prime n_cls) fall back to a cdiv grid whose final
    # partial class block Pallas clamps on read/write.
    div_block = _pick_class_block(n_cls, cls_block)
    if div_block >= max(8, cls_block // 2) or div_block == cls_block:
        cls_block = div_block
        grid = (n_cls // cls_block,)
    else:
        # TODO(synk): partial-tail grid path not exercised in __main__.
        grid = (pl.cdiv(n_cls, cls_block),)

    working = (2 * cls_block * itemsize * ctx_dim * (1 + n_suffix + seq)
               + cls_block * ctx_bytes + 2 * ctx_bytes)
    vmem_limit = int(min(cap, max(working + (8 << 20), 32 << 20)))

    bytes_accessed = int(itemsize * (
        n_ctx * ctx_dim                              # ctx (read once)
        + n_cls * ctx_dim * (1 + n_suffix)           # prefix + suffix reads
        + n_cls * seq * ctx_dim))                    # output writes

    return pl.pallas_call(
        _make_concat_kernel(n_ctx, n_suffix),
        out_shape=jax.ShapeDtypeStruct((n_cls, seq, ctx_dim), out_dtype),
        grid_spec=pltpu.PrefetchScalarGridSpec(
            num_scalar_prefetch=0,
            grid=grid,
            in_specs=[
                # ctx shared by every class block: constant block index -> no re-DMA.
                pl.BlockSpec((n_ctx, ctx_dim), lambda i: (0, 0)),
                pl.BlockSpec((cls_block, 1, ctx_dim), lambda i: (i, 0, 0)),
                pl.BlockSpec((cls_block, n_suffix, ctx_dim), lambda i: (i, 0, 0)),
            ],
            out_specs=pl.BlockSpec((cls_block, seq, ctx_dim),
                                   lambda i: (i, 0, 0)),
            scratch_shapes=[
                pltpu.VMEM((cls_block, n_ctx, ctx_dim), out_dtype),
                pltpu.SemaphoreType.DMA((3,)),
            ],
        ),
        compiler_params=pltpu.CompilerParams(
            dimension_semantics=("parallel",),
            vmem_limit_bytes=vmem_limit,
        ),
        cost_estimate=pl.CostEstimate(
            flops=0, transcendentals=0, bytes_accessed=bytes_accessed),
    )(ctx, token_prefix, token_suffix)


# ---------------------------------------------------------------------------
# Path 2 (production default after the first call): frozen prefix/suffix rows
# stay in place -- only rows [1, 1 + n_ctx) of a persistent prompts buffer are
# overwritten with the (broadcast) learned ctx. HBM traffic drops from
# ~2*seq rows/class to ~n_ctx rows/class.
# ---------------------------------------------------------------------------
def _make_ctx_write_kernel(n_ctx, cls_block, n_cls, ring):
    num_full = n_cls // cls_block
    rem = n_cls - num_full * cls_block
    num_blocks = num_full + (1 if rem else 0)

    def kernel(ctx_ref, base_hbm, out_hbm, bcast, sems):
        # base_hbm is aliased with out_hbm; the frozen prefix/suffix rows are
        # never touched -- only the ctx rows of every class are rewritten.
        del base_hbm
        # Single invocation (no grid): broadcast the ctx exactly once.
        bcast[...] = jnp.broadcast_to(ctx_ref[...][None, :, :], bcast.shape)

        def copy(b, slot):
            start = b * cls_block
            count = cls_block if b < num_full else rem
            src = bcast if count == cls_block else bcast.at[pl.ds(0, count)]
            dst = out_hbm.at[pl.ds(start, count), pl.ds(1, n_ctx), :]
            return pltpu.make_async_copy(src, dst, sems.at[slot])

        # ONE large strided DMA per class block, up to `ring` in flight: the
        # broadcast source is read-only, so overlapping the writes keeps the
        # DMA engine saturated against the HBM write roofline.
        for b in range(num_blocks):
            slot = b % ring
            if b >= ring:
                copy(b - ring, slot).wait()   # recycle this slot's semaphore
            copy(b, slot).start()
        for b in range(max(0, num_blocks - ring), num_blocks):
            copy(b, b % ring).wait()

    return kernel


def prompt_learner_forward_inplace(ctx, base_prompts, n_ctx, *, cls_block=None):
    """Refresh rows [1, 1 + n_ctx) of a persistent prompts buffer with ctx.

    base_prompts: (n_cls, seq, ctx_dim) buffer already holding the frozen
    prefix/suffix rows (and any stale ctx rows). Returns the aliased buffer
    with the context rows refreshed; all other rows untouched.

    Note: the caller should treat `base_prompts` as donated — if XLA cannot
    alias it, a silent full copy preserves correctness but loses the
    bandwidth advantage.
    """
    n_cls, seq, ctx_dim = base_prompts.shape
    assert 1 + n_ctx <= seq
    ctx = ctx.astype(base_prompts.dtype)
    itemsize = jnp.dtype(base_prompts.dtype).itemsize

    if cls_block is None:
        # Only the broadcast scratch + ctx live in VMEM; make blocks big so a
        # handful of large strided DMAs cover all classes.
        per_class = n_ctx * ctx_dim * itemsize
        cls_block = max(1, int(_vmem_capacity_bytes() * 0.4) // per_class)
    cls_block = max(1, min(int(cls_block), n_cls))
    num_blocks = (n_cls + cls_block - 1) // cls_block
    ring = int(min(num_blocks, 4))

    bytes_accessed = int(itemsize * n_ctx * ctx_dim * (1 + n_cls))

    return pl.pallas_call(
        _make_ctx_write_kernel(n_ctx, cls_block, n_cls, ring),
        out_shape=jax.ShapeDtypeStruct(base_prompts.shape, base_prompts.dtype),
        in_specs=[
            pl.BlockSpec(memory_space=pltpu.MemorySpace.VMEM),   # ctx
            pl.BlockSpec(memory_space=pl.ANY),                   # prompts (HBM)
        ],
        out_specs=pl.BlockSpec(memory_space=pl.ANY),
        scratch_shapes=[
            pltpu.VMEM((cls_block, n_ctx, ctx_dim), base_prompts.dtype),
            pltpu.SemaphoreType.DMA((ring,)),
        ],
        input_output_aliases={1: 0},   # prompts buffer updated in place
        compiler_params=pltpu.CompilerParams(has_side_effects=True),
        cost_estimate=pl.CostEstimate(
            flops=0, transcendentals=0, bytes_accessed=bytes_accessed),
    )(ctx, base_prompts)


# ---------------------------------------------------------------------------
# Test harness.
# ---------------------------------------------------------------------------
def _reference(ctx, token_prefix, token_suffix):
    n_cls = token_prefix.shape[0]
    ctx_b = jnp.broadcast_to(ctx[None, :, :].astype(token_prefix.dtype),
                             (n_cls,) + ctx.shape)
    return jnp.concatenate([token_prefix, ctx_b, token_suffix], axis=1)


def _run_case(name, *, n_cls, n_ctx, seq, ctx_dim, dtype,
              cls_block_p1=None, cls_block_p2=None):
    n_suffix = seq - 1 - n_ctx
    key = jax.random.PRNGKey(0)
    k_ctx, k_emb = jax.random.split(key)

    # nn.init.normal_(ctx_vectors, std=0.02); frozen token embeddings synthetic.
    ctx = (0.02 * jax.random.normal(k_ctx, (n_ctx, ctx_dim),
                                    dtype=jnp.float32)).astype(dtype)
    embedding = jax.random.normal(k_emb, (n_cls, seq, ctx_dim),
                                  dtype=jnp.float32).astype(dtype)
    token_prefix = embedding[:, :1, :]            # SOS
    token_suffix = embedding[:, 1 + n_ctx:, :]    # class tokens + EOS + padding

    ref = _reference(ctx, token_prefix, token_suffix)

    # Path 1: full concat (first call / fallback).
    prompts = prompt_learner_forward(ctx, token_prefix, token_suffix,
                                     cls_block=cls_block_p1)
    prompts = jax.block_until_ready(prompts)
    assert prompts.shape == (n_cls, seq, ctx_dim), name
    assert prompts.dtype == token_prefix.dtype, name
    assert jnp.array_equal(prompts, ref), f"{name}: concat kernel mismatch"

    # Path 2 (production): refresh only the ctx rows of the persistent buffer;
    # rows [1, 1+n_ctx) of `embedding` hold stale values that get overwritten.
    prompts2 = prompt_learner_forward_inplace(ctx, embedding, n_ctx,
                                              cls_block=cls_block_p2)
    prompts2 = jax.block_until_ready(prompts2)
    assert jnp.array_equal(prompts2, ref), f"{name}: in-place kernel mismatch"


if __name__ == "__main__":
    # Small deterministic setups consistent with the module's __init__.
    # Case A: sublane-aligned seq, auto block sizing (single big block).
    _run_case("aligned_f32", n_cls=16, n_ctx=4, seq=16, ctx_dim=128,
              dtype=jnp.float32)
    # Case B: misaligned seq (like CLIP's 77), forced small blocks so the
    # multi-block grid (Path 1) and the strided-DMA tail + ring (Path 2)
    # are exercised.
    _run_case("misaligned_f32", n_cls=12, n_ctx=5, seq=13, ctx_dim=128,
              dtype=jnp.float32, cls_block_p1=6, cls_block_p2=5)

    # TODO(synk): 'middle'/'front' class_token_position branches (ragged
    # per-class name_lens) are not implemented; the module always uses 'end'.
    # TODO(synk): sub-32-bit embeddings (bf16/fp8) place the ctx rows at an
    # odd sublane offset (row 1); if the strided DMA writes need word
    # granularity there, pack 2xbf16 -> u32 via pltpu.bitcast before copying.
    print("KERNEL_OK")
</pallas_src>

<mosaic_0001>
module attributes {stable_mosaic.version = 11 : i64} {
  func.func @kernel(%arg0: i32, %arg1: memref<4x128xf32, #tpu.memory_space<vmem>>, %arg2: memref<16x1x128xf32, #tpu.memory_space<vmem>>, %arg3: memref<16x11x128xf32, #tpu.memory_space<vmem>>, %arg4: memref<16x16x128xf32, #tpu.memory_space<vmem>>, %arg5: memref<16x4x128xf32, #tpu.memory_space<vmem>>, %arg6: memref<3x!tpu.dma_semaphore, #tpu.memory_space<semaphore_mem>>) attributes {dimension_semantics = [#tpu.dimension_semantics<parallel>], iteration_bounds = array<i64: 1>, scalar_prefetch = 0 : i64, scratch_operands = 2 : i64, tpu.core_type = #tpu.core_type<tc>, window_params = [{pipeline_mode = #tpu.pipeline_mode<synchronous>, transform_indices = @transform_0, window_bounds = array<i64: 4, 128>}, {transform_indices = @transform_1, window_bounds = array<i64: 16, 1, 128>}, {transform_indices = @transform_2, window_bounds = array<i64: 16, 11, 128>}, {transform_indices = @transform_3, window_bounds = array<i64: 16, 16, 128>}]} {
    %c0 = arith.constant 0 : index
    %c0_0 = arith.constant 0 : index
    %0 = vector.load %arg1[%c0, %c0_0] : memref<4x128xf32, #tpu.memory_space<vmem>>, vector<4x128xf32>
    %1 = vector.shape_cast %0 : vector<4x128xf32> to vector<1x4x128xf32>
    %2 = vector.shape_cast %1 : vector<1x4x128xf32> to vector<1x4x128xf32>
    %3 = vector.broadcast %2 : vector<1x4x128xf32> to vector<16x4x128xf32>
    %c0_1 = arith.constant 0 : index
    %c0_2 = arith.constant 0 : index
    %c0_3 = arith.constant 0 : index
    %4 = vector.load %arg5[%c0_1, %c0_2, %c0_3] : memref<16x4x128xf32, #tpu.memory_space<vmem>>, vector<16x4x128xf32>
    tpu.vector_store %arg5[%c0_1, %c0_2, %c0_3], %3 {strides = array<i32>} : memref<16x4x128xf32, #tpu.memory_space<vmem>>, vector<16x4x128xf32>,
    %c0_i32 = arith.constant 0 : i32
    %c0_i32_4 = arith.constant 0 : i32
    %c0_i32_5 = arith.constant 0 : i32
    %c0_i32_6 = arith.constant 0 : i32
    %5 = tpu.memref_slice %arg4[%c0_i32_4, %c0_i32_5, %c0_i32_6] : memref<16x16x128xf32, #tpu.memory_space<vmem>> -> memref<16x1x128xf32, #tpu.memory_space<vmem>>
    %6 = tpu.memref_slice %arg6[%c0_i32] : memref<3x!tpu.dma_semaphore, #tpu.memory_space<semaphore_mem>> -> memref<1x!tpu.dma_semaphore, #tpu.memory_space<semaphore_mem>>
    %7 = tpu.memref_squeeze %6 : memref<1x!tpu.dma_semaphore, #tpu.memory_space<semaphore_mem>> -> memref<!tpu.dma_semaphore, #tpu.memory_space<semaphore_mem>>
    tpu.enqueue_dma source(%arg2 : memref<16x1x128xf32, #tpu.memory_space<vmem>>) target(%5 : memref<16x1x128xf32, #tpu.memory_space<vmem>>) target_semaphore(%7 : memref<!tpu.dma_semaphore, #tpu.memory_space<semaphore_mem>>)
    %c1_i32 = arith.constant 1 : i32
    %c0_i32_7 = arith.constant 0 : i32
    %c1_i32_8 = arith.constant 1 : i32
    %c0_i32_9 = arith.constant 0 : i32
    %8 = tpu.memref_slice %arg4[%c0_i32_7, %c1_i32_8, %c0_i32_9] : memref<16x16x128xf32, #tpu.memory_space<vmem>> -> memref<16x4x128xf32, #tpu.memory_space<vmem>>
    %9 = tpu.memref_slice %arg6[%c1_i32] : memref<3x!tpu.dma_semaphore, #tpu.memory_space<semaphore_mem>> -> memref<1x!tpu.dma_semaphore, #tpu.memory_space<semaphore_mem>>
    %10 = tpu.memref_squeeze %9 : memref<1x!tpu.dma_semaphore, #tpu.memory_space<semaphore_mem>> -> memref<!tpu.dma_semaphore, #tpu.memory_space<semaphore_mem>>
    tpu.enqueue_dma source(%arg5 : memref<16x4x128xf32, #tpu.memory_space<vmem>>) target(%8 : memref<16x4x128xf32, #tpu.memory_space<vmem>>) target_semaphore(%10 : memref<!tpu.dma_semaphore, #tpu.memory_space<semaphore_mem>>)
    %c2_i32 = arith.constant 2 : i32
    %c0_i32_10 = arith.constant 0 : i32
    %c5_i32 = arith.constant 5 : i32
    %c0_i32_11 = arith.constant 0 : i32
    %11 = tpu.memref_slice %arg4[%c0_i32_10, %c5_i32, %c0_i32_11] : memref<16x16x128xf32, #tpu.memory_space<vmem>> -> memref<16x11x128xf32, #tpu.memory_space<vmem>>
    %12 = tpu.memref_slice %arg6[%c2_i32] : memref<3x!tpu.dma_semaphore, #tpu.memory_space<semaphore_mem>> -> memref<1x!tpu.dma_semaphore, #tpu.memory_space<semaphore_mem>>
    %13 = tpu.memref_squeeze %12 : memref<1x!tpu.dma_semaphore, #tpu.memory_space<semaphore_mem>> -> memref<!tpu.dma_semaphore, #tpu.memory_space<semaphore_mem>>
    tpu.enqueue_dma source(%arg3 : memref<16x11x128xf32, #tpu.memory_space<vmem>>) target(%11 : memref<16x11x128xf32, #tpu.memory_space<vmem>>) target_semaphore(%13 : memref<!tpu.dma_semaphore, #tpu.memory_space<semaphore_mem>>)
    %c0_i32_12 = arith.constant 0 : i32
    %c0_i32_13 = arith.constant 0 : i32
    %c0_i32_14 = arith.constant 0 : i32
    %c0_i32_15 = arith.constant 0 : i32
    %14 = tpu.memref_slice %arg4[%c0_i32_13, %c0_i32_14, %c0_i32_15] : memref<16x16x128xf32, #tpu.memory_space<vmem>> -> memref<16x1x128xf32, #tpu.memory_space<vmem>>
    %15 = tpu.memref_slice %arg6[%c0_i32_12] : memref<3x!tpu.dma_semaphore, #tpu.memory_space<semaphore_mem>> -> memref<1x!tpu.dma_semaphore, #tpu.memory_space<semaphore_mem>>
    %16 = tpu.memref_squeeze %15 : memref<1x!tpu.dma_semaphore, #tpu.memory_space<semaphore_mem>> -> memref<!tpu.dma_semaphore, #tpu.memory_space<semaphore_mem>>
    tpu.wait_dma2 semaphore(%16 : memref<!tpu.dma_semaphore, #tpu.memory_space<semaphore_mem>>) src(%arg2 : memref<16x1x128xf32, #tpu.memory_space<vmem>>) dst(%14 : memref<16x1x128xf32, #tpu.memory_space<vmem>>)
    %c1_i32_16 = arith.constant 1 : i32
    %c0_i32_17 = arith.constant 0 : i32
    %c1_i32_18 = arith.constant 1 : i32
    %c0_i32_19 = arith.constant 0 : i32
    %17 = tpu.memref_slice %arg4[%c0_i32_17, %c1_i32_18, %c0_i32_19] : memref<16x16x128xf32, #tpu.memory_space<vmem>> -> memref<16x4x128xf32, #tpu.memory_space<vmem>>
    %18 = tpu.memref_slice %arg6[%c1_i32_16] : memref<3x!tpu.dma_semaphore, #tpu.memory_space<semaphore_mem>> -> memref<1x!tpu.dma_semaphore, #tpu.memory_space<semaphore_mem>>
    %19 = tpu.memref_squeeze %18 : memref<1x!tpu.dma_semaphore, #tpu.memory_space<semaphore_mem>> -> memref<!tpu.dma_semaphore, #tpu.memory_space<semaphore_mem>>
    tpu.wait_dma2 semaphore(%19 : memref<!tpu.dma_semaphore, #tpu.memory_space<semaphore_mem>>) src(%arg5 : memref<16x4x128xf32, #tpu.memory_space<vmem>>) dst(%17 : memref<16x4x128xf32, #tpu.memory_space<vmem>>)
    %c2_i32_20 = arith.constant 2 : i32
    %c0_i32_21 = arith.constant 0 : i32
    %c5_i32_22 = arith.constant 5 : i32
    %c0_i32_23 = arith.constant 0 : i32
    %20 = tpu.memref_slice %arg4[%c0_i32_21, %c5_i32_22, %c0_i32_23] : memref<16x16x128xf32, #tpu.memory_space<vmem>> -> memref<16x11x128xf32, #tpu.memory_space<vmem>>
    %21 = tpu.memref_slice %arg6[%c2_i32_20] : memref<3x!tpu.dma_semaphore, #tpu.memory_space<semaphore_mem>> -> memref<1x!tpu.dma_semaphore, #tpu.memory_space<semaphore_mem>>
    %22 = tpu.memref_squeeze %21 : memref<1x!tpu.dma_semaphore, #tpu.memory_space<semaphore_mem>> -> memref<!tpu.dma_semaphore, #tpu.memory_space<semaphore_mem>>
    tpu.wait_dma2 semaphore(%22 : memref<!tpu.dma_semaphore, #tpu.memory_space<semaphore_mem>>) src(%arg3 : memref<16x11x128xf32, #tpu.memory_space<vmem>>) dst(%20 : memref<16x11x128xf32, #tpu.memory_space<vmem>>)
    return
  }
  func.func @transform_0(%arg0: i32) -> (i32, i32) {
    %c0_i32 = arith.constant 0 : i32
    %c0_i32_0 = arith.constant 0 : i32
    %c0_i32_1 = arith.constant 0 : i32
    return %c0_i32, %c0_i32_0 : i32, i32
  }
  func.func @transform_1(%arg0: i32) -> (i32, i32, i32) {
    %c0_i32 = arith.constant 0 : i32
    %c0_i32_0 = arith.constant 0 : i32
    %c0_i32_1 = arith.constant 0 : i32
    return %arg0, %c0_i32, %c0_i32_0 : i32, i32, i32
  }
  func.func @transform_2(%arg0: i32) -> (i32, i32, i32) {
    %c0_i32 = arith.constant 0 : i32
    %c0_i32_0 = arith.constant 0 : i32
    %c0_i32_1 = arith.constant 0 : i32
    return %arg0, %c0_i32, %c0_i32_0 : i32, i32, i32
  }
  func.func @transform_3(%arg0: i32) -> (i32, i32, i32) {
    %c0_i32 = arith.constant 0 : i32
    %c0_i32_0 = arith.constant 0 : i32
    %c0_i32_1 = arith.constant 0 : i32
    return %arg0, %c0_i32, %c0_i32_0 : i32, i32, i32
  }
}

</mosaic_0001>

<bundles_post_ra>
// kernel: tpu_custom_call.1
= control target key start
LH: loop header
LB: loop body
LE: loop exit
PB: predicated region body
PF: predicated region fallthrough
CT: control target
= control target key end

     0   :  { %8 = vsyncpa [#allocation5], 0  ;;  %s730_s0 = inlined_call_operand.vmem [shape: f32[4,128], index: 0, kind: input, shape index: {}]   ;;  %s731_s1 = inlined_call_operand.vmem [shape: f32[16,1,128], index: 1, kind: input, shape index: {}]   ;;  %s732_s2 = inlined_call_operand.vmem [shape: f32[16,11,128], index: 2, kind: input, shape index: {}]   ;;  %s733_s3 = inlined_call_operand.hbm [shape: f32[16,16,128], index: 3, kind: output, shape index: {}]  }
   0x1   :  { %v15_v0 = vld [vmem:[%s730_s0] sm:$0xf]  ;;  %v57_v5 = vld [vmem:[%s731_s1 + $0x4] sm:$0x1]  ;;  %v59_v6 = vld [vmem:[%s731_s1 + $0x5] sm:$0x1] }
   0x2   :  { %v49_v1 = vld [vmem:[%s731_s1] sm:$0x1]  ;;  %16 = vst [vmem:[#allocation2] sm:$0xf] %v15_v0  ;;  %17 = vst [vmem:[#allocation2 + $0x4] sm:$0xf] %v15_v0 }
   0x3   :  { %18 = vst [vmem:[#allocation2 + $0x8] sm:$0xf] %v15_v0  ;;  %19 = vst [vmem:[#allocation2 + $0xc] sm:$0xf] %v15_v0  ;;  %v51_v2 = vld [vmem:[%s731_s1 + $0x1] sm:$0x1] }
   0x4   :  { %20 = vst [vmem:[#allocation2 + $0x10] sm:$0xf] %v15_v0  ;;  %21 = vst [vmem:[#allocation2 + $0x14] sm:$0xf] %v15_v0  ;;  %v53_v3 = vld [vmem:[%s731_s1 + $0x2] sm:$0x1] }
   0x5   :  { %22 = vst [vmem:[#allocation2 + $0x18] sm:$0xf] %v15_v0  ;;  %23 = vst [vmem:[#allocation2 + $0x1c] sm:$0xf] %v15_v0  ;;  %v55_v4 = vld [vmem:[%s731_s1 + $0x3] sm:$0x1] }
   0x6   :  { %24 = vst [vmem:[#allocation2 + $0x20] sm:$0xf] %v15_v0  ;;  %25 = vst [vmem:[#allocation2 + $0x24] sm:$0xf] %v15_v0  ;;  %v61_v7 = vld [vmem:[%s731_s1 + $0x6] sm:$0x1] }
   0x7   :  { %26 = vst [vmem:[#allocation2 + $0x28] sm:$0xf] %v15_v0  ;;  %27 = vst [vmem:[#allocation2 + $0x2c] sm:$0xf] %v15_v0  ;;  %v63_v8 = vld [vmem:[%s731_s1 + $0x7] sm:$0x1] }
   0x8   :  { %28 = vst [vmem:[#allocation2 + $0x30] sm:$0xf] %v15_v0  ;;  %29 = vst [vmem:[#allocation2 + $0x34] sm:$0xf] %v15_v0  ;;  %v65_v9 = vld [vmem:[%s731_s1 + $0x8] sm:$0x1] }
   0x9   :  { %30 = vst [vmem:[#allocation2 + $0x38] sm:$0xf] %v15_v0  ;;  %31 = vst [vmem:[#allocation2 + $0x3c] sm:$0xf] %v15_v0  ;;  %v67_v10 = vld [vmem:[%s731_s1 + $0x9] sm:$0x1] }
   0xa   :  { %50 = vst [vmem:[#allocation4] sm:$0x1] %v49_v1  ;;  %52 = vst [vmem:[#allocation4 + $0x10] sm:$0x1] %v51_v2  ;;  %v69_v11 = vld [vmem:[%s731_s1 + $0xa] sm:$0x1] }
   0xb   :  { %54 = vst [vmem:[#allocation4 + $0x20] sm:$0x1] %v53_v3  ;;  %56 = vst [vmem:[#allocation4 + $0x30] sm:$0x1] %v55_v4  ;;  %v71_v12 = vld [vmem:[%s731_s1 + $0xb] sm:$0x1] }
   0xc   :  { %58 = vst [vmem:[#allocation4 + $0x40] sm:$0x1] %v57_v5  ;;  %60 = vst [vmem:[#allocation4 + $0x50] sm:$0x1] %v59_v6  ;;  %v73_v13 = vld [vmem:[%s731_s1 + $0xc] sm:$0x1] }
   0xd   :  { %62 = vst [vmem:[#allocation4 + $0x60] sm:$0x1] %v61_v7  ;;  %64 = vst [vmem:[#allocation4 + $0x70] sm:$0x1] %v63_v8  ;;  %v75_v14 = vld [vmem:[%s731_s1 + $0xd] sm:$0x1] }
   0xe   :  { %66 = vst [vmem:[#allocation4 + $0x80] sm:$0x1] %v65_v9  ;;  %68 = vst [vmem:[#allocation4 + $0x90] sm:$0x1] %v67_v10  ;;  %v77_v15 = vld [vmem:[%s731_s1 + $0xe] sm:$0x1] }
   0xf   :  { %70 = vst [vmem:[#allocation4 + $0xa0] sm:$0x1] %v69_v11  ;;  %72 = vst [vmem:[#allocation4 + $0xb0] sm:$0x1] %v71_v12  ;;  %v79_v16 = vld [vmem:[%s731_s1 + $0xf] sm:$0x1] }
  0x10   :  { %74 = vst [vmem:[#allocation4 + $0xc0] sm:$0x1] %v73_v13  ;;  %76 = vst [vmem:[#allocation4 + $0xd0] sm:$0x1] %v75_v14 }
  0x11   :  { %78 = vst [vmem:[#allocation4 + $0xe0] sm:$0x1] %v77_v15  ;;  %80 = vst [vmem:[#allocation4 + $0xf0] sm:$0x1] %v79_v16 }
  0x12   :  { %143 = vsyncadd [#allocation3], 256  ;;  %v163_v17 = vld [vmem:[#allocation2] sm:$0xf]  ;;  %v165_v18 = vld [vmem:[#allocation2 + $0x4] sm:$0xf] }
  0x13   :  { %164 = vst [vmem:[#allocation4 + $0x1] sm:$0xf] %v163_v17  ;;  %166 = vst [vmem:[#allocation4 + $0x11] sm:$0xf] %v165_v18  ;;  %v167_v19 = vld [vmem:[#allocation2 + $0x8] sm:$0xf] }
  0x14   :  { %v169_v20 = vld [vmem:[#allocation2 + $0xc] sm:$0xf]  ;;  %v171_v21 = vld [vmem:[#allocation2 + $0x10] sm:$0xf]  ;;  %168 = vst [vmem:[#allocation4 + $0x21] sm:$0xf] %v167_v19 }
  0x15   :  { %170 = vst [vmem:[#allocation4 + $0x31] sm:$0xf] %v169_v20  ;;  %172 = vst [vmem:[#allocation4 + $0x41] sm:$0xf] %v171_v21  ;;  %v173_v22 = vld [vmem:[#allocation2 + $0x14] sm:$0xf] }
  0x16   :  { %v175_v23 = vld [vmem:[#allocation2 + $0x18] sm:$0xf]  ;;  %v177_v24 = vld [vmem:[#allocation2 + $0x1c] sm:$0xf]  ;;  %174 = vst [vmem:[#allocation4 + $0x51] sm:$0xf] %v173_v22 }
  0x17   :  { %176 = vst [vmem:[#allocation4 + $0x61] sm:$0xf] %v175_v23  ;;  %178 = vst [vmem:[#allocation4 + $0x71] sm:$0xf] %v177_v24  ;;  %v179_v25 = vld [vmem:[#allocation2 + $0x20] sm:$0xf] }
  0x18   :  { %v181_v26 = vld [vmem:[#allocation2 + $0x24] sm:$0xf]  ;;  %v183_v27 = vld [vmem:[#allocation2 + $0x28] sm:$0xf]  ;;  %180 = vst [vmem:[#allocation4 + $0x81] sm:$0xf] %v179_v25 }
  0x19   :  { %182 = vst [vmem:[#allocation4 + $0x91] sm:$0xf] %v181_v26  ;;  %184 = vst [vmem:[#allocation4 + $0xa1] sm:$0xf] %v183_v27  ;;  %v185_v28 = vld [vmem:[#allocation2 + $0x2c] sm:$0xf] }
  0x1a   :  { %v187_v29 = vld [vmem:[#allocation2 + $0x30] sm:$0xf]  ;;  %v189_v30 = vld [vmem:[#allocation2 + $0x34] sm:$0xf]  ;;  %186 = vst [vmem:[#allocation4 + $0xb1] sm:$0xf] %v185_v28 }
  0x1b   :  { %188 = vst [vmem:[#allocation4 + $0xc1] sm:$0xf] %v187_v29  ;;  %190 = vst [vmem:[#allocation4 + $0xd1] sm:$0xf] %v189_v30  ;;  %v191_v31 = vld [vmem:[#allocation2 + $0x38] sm:$0xf] }
  0x1c   :  { %v193_v32 = vld [vmem:[#allocation2 + $0x3c] sm:$0xf]  ;;  %192 = vst [vmem:[#allocation4 + $0xe1] sm:$0xf] %v191_v31 }
  0x1d   :  { %194 = vst [vmem:[#allocation4 + $0xf1] sm:$0xf] %v193_v32 }
  0x1e   :  { %257 = vsyncadd [#allocation3 + $0x1], 1024  ;;  %v327_v33 = vld [vmem:[%s732_s2] sm:$0xff]  ;;  %v329_v34 = vld [vmem:[%s732_s2 + $0x10] sm:$0xff] }
  0x1f   :  { %328 = vst [vmem:[#allocation4 + $0x5] sm:$0xff] %v327_v33  ;;  %330 = vst [vmem:[#allocation4 + $0x15] sm:$0xff] %v329_v34  ;;  %v331_v35 = vld [vmem:[%s732_s2 + $0x20] sm:$0xff]  ;;  %v333_v36 = vld [vmem:[%s732_s2 + $0x30] sm:$0xff] }
  0x20   :  { %v335_v37 = vld [vmem:[%s732_s2 + $0x40] sm:$0xff]  ;;  %332 = vst [vmem:[#allocation4 + $0x25] sm:$0xff] %v331_v35  ;;  %334 = vst [vmem:[#allocation4 + $0x35] sm:$0xff] %v333_v36  ;;  %v337_v38 = vld [vmem:[%s732_s2 + $0x50] sm:$0xff] }
  0x21   :  { %336 = vst [vmem:[#allocation4 + $0x45] sm:$0xff] %v335_v37  ;;  %v339_v39 = vld [vmem:[%s732_s2 + $0x60] sm:$0xff]  ;;  %v341_v40 = vld [vmem:[%s732_s2 + $0x70] sm:$0xff]  ;;  %338 = vst [vmem:[#allocation4 + $0x55] sm:$0xff] %v337_v38 }
  0x22   :  { %340 = vst [vmem:[#allocation4 + $0x65] sm:$0xff] %v339_v39  ;;  %342 = vst [vmem:[#allocation4 + $0x75] sm:$0xff] %v341_v40  ;;  %v343_v41 = vld [vmem:[%s732_s2 + $0x80] sm:$0xff]  ;;  %v345_v42 = vld [vmem:[%s732_s2 + $0x90] sm:$0xff] }
  0x23   :  { %v347_v43 = vld [vmem:[%s732_s2 + $0xa0] sm:$0xff]  ;;  %344 = vst [vmem:[#allocation4 + $0x85] sm:$0xff] %v343_v41  ;;  %346 = vst [vmem:[#allocation4 + $0x95] sm:$0xff] %v345_v42  ;;  %v349_v44 = vld [vmem:[%s732_s2 + $0xb0] sm:$0xff] }
  0x24   :  { %348 = vst [vmem:[#allocation4 + $0xa5] sm:$0xff] %v347_v43  ;;  %v351_v45 = vld [vmem:[%s732_s2 + $0xc0] sm:$0xff]  ;;  %v353_v46 = vld [vmem:[%s732_s2 + $0xd0] sm:$0xff]  ;;  %350 = vst [vmem:[#allocation4 + $0xb5] sm:$0xff] %v349_v44 }
  0x25   :  { %352 = vst [vmem:[#allocation4 + $0xc5] sm:$0xff] %v351_v45  ;;  %354 = vst [vmem:[#allocation4 + $0xd5] sm:$0xff] %v353_v46  ;;  %v355_v47 = vld [vmem:[%s732_s2 + $0xe0] sm:$0xff]  ;;  %v357_v48 = vld [vmem:[%s732_s2 + $0xf0] sm:$0xff] }
  0x26   :  { %v496_v49 = vld [vmem:[%s732_s2 + $0x8] sm:$0x7]  ;;  %356 = vst [vmem:[#allocation4 + $0xe5] sm:$0xff] %v355_v47  ;;  %358 = vst [vmem:[#allocation4 + $0xf5] sm:$0xff] %v357_v48  ;;  %v497_v50 = vld [vmem:[%s732_s2 + $0x18] sm:$0x7] }
  0x27   :  { %369 = vst [vmem:[#allocation4 + $0xd] sm:$0x7] %v496_v49  ;;  %v498_v51 = vld [vmem:[%s732_s2 + $0x28] sm:$0x7]  ;;  %v499_v52 = vld [vmem:[%s732_s2 + $0x38] sm:$0x7] }
  0x28   :  { %371 = vst [vmem:[#allocation4 + $0x1d] sm:$0x7] %v497_v50  ;;  %373 = vst [vmem:[#allocation4 + $0x2d] sm:$0x7] %v498_v51  ;;  %v500_v53 = vld [vmem:[%s732_s2 + $0x48] sm:$0x7] }
  0x29   :  { %375 = vst [vmem:[#allocation4 + $0x3d] sm:$0x7] %v499_v52  ;;  %v501_v54 = vld [vmem:[%s732_s2 + $0x58] sm:$0x7]  ;;  %v502_v55 = vld [vmem:[%s732_s2 + $0x68] sm:$0x7] }
  0x2a   :  { %377 = vst [vmem:[#allocation4 + $0x4d] sm:$0x7] %v500_v53  ;;  %379 = vst [vmem:[#allocation4 + $0x5d] sm:$0x7] %v501_v54  ;;  %v503_v56 = vld [vmem:[%s732_s2 + $0x78] sm:$0x7] }
  0x2b   :  { %381 = vst [vmem:[#allocation4 + $0x6d] sm:$0x7] %v502_v55  ;;  %v504_v57 = vld [vmem:[%s732_s2 + $0x88] sm:$0x7]  ;;  %v505_v58 = vld [vmem:[%s732_s2 + $0x98] sm:$0x7] }
  0x2c   :  { %383 = vst [vmem:[#allocation4 + $0x7d] sm:$0x7] %v503_v56  ;;  %385 = vst [vmem:[#allocation4 + $0x8d] sm:$0x7] %v504_v57  ;;  %v506_v59 = vld [vmem:[%s732_s2 + $0xa8] sm:$0x7] }
  0x2d   :  { %387 = vst [vmem:[#allocation4 + $0x9d] sm:$0x7] %v505_v58  ;;  %v507_v60 = vld [vmem:[%s732_s2 + $0xb8] sm:$0x7]  ;;  %v508_v61 = vld [vmem:[%s732_s2 + $0xc8] sm:$0x7] }
  0x2e   :  { %389 = vst [vmem:[#allocation4 + $0xad] sm:$0x7] %v506_v59  ;;  %391 = vst [vmem:[#allocation4 + $0xbd] sm:$0x7] %v507_v60  ;;  %v509_v62 = vld [vmem:[%s732_s2 + $0xd8] sm:$0x7] }
  0x2f   :  { %393 = vst [vmem:[#allocation4 + $0xcd] sm:$0x7] %v508_v61  ;;  %v510_v63 = vld [vmem:[%s732_s2 + $0xe8] sm:$0x7]  ;;  %v511_v0 = vld [vmem:[%s732_s2 + $0xf8] sm:$0x7] }
  0x30   :  { %395 = vst [vmem:[#allocation4 + $0xdd] sm:$0x7] %v509_v62  ;;  %397 = vst [vmem:[#allocation4 + $0xed] sm:$0x7] %v510_v63 }
  0x31   :  { %399 = vst [vmem:[#allocation4 + $0xfd] sm:$0x7] %v511_v0 }
  0x32   :  { %403 = vsyncadd [#allocation3 + $0x2], 2816 }
  0x33   :  { %540 = dma.done.wait [#allocation3], 256 }
  0x34   :  { %541 = vsyncadd [#allocation3], 4294967040 }
  0x35   :  { %542 = dma.done.wait [#allocation3 + $0x1], 1024 }
  0x36   :  { %543 = vsyncadd [#allocation3 + $0x1], 4294966272 }
  0x37   :  { %544 = dma.done.wait [#allocation3 + $0x2], 2816 }
  0x38   :  { %545 = vsyncadd [#allocation3 + $0x2], 4294964480  ;;  %s548_s22 = smov [#allocation4]  }
  0x39   :  { %s421_s23 = sshll.u32 %s548_s22, 4  ;;  %s422_s23 = int_to_ptr.vmem [resolvable:$true] %s421_s23 }
  0x3a   :  { %s518_s24 = scalar_lea.vmem %s422_s23, 4096  ;;  %p523_p1 = scmp.lt.s32.totalorder %s422_s23, %s422_s23 }
  0x3b   :  { %p519_p0 = scmp.ne.s32.totalorder %s422_s23, %s518_s24  ;;  %p524_p2 = scmp.lt.s32.totalorder %s518_s24, %s518_s24 }
  0x3d   :  { %p525_p3 = por %p524_p2, %p523_p1 }
  0x3f   :  { %p526_p4 = pnand %p525_p3, %p519_p0 }
  0x41   :  { %529 = shalt.err (!%p526_p4)
}
  0x42   :  { %s530_s26 = scalar_lea.hbm %s733_s3, 4096 }
  0x43   :  { %p531_p5 = scmp.ne.s32.totalorder %s733_s3, %s530_s26  ;;  %p534_p6 = scmp.lt.u32.totalorder %s530_s26, %s733_s3 }
  0x45   :  { %p536_p7 = pnand %p534_p6, %p531_p5 }
  0x47   :  { %539 = shalt.err (!%p536_p7)
}
  0x48   :  { %s549_s4 = smov 128   ;;  %s550_s5 = smov 8  }
  0x49   :  { %427 = dma.vmem_to_hbm [thread:$0]  %s422_s23, 4096, %s733_s3, [#allocation5], %s549_s4, %s549_s4, %s550_s5  }
  0x4a   :  { %546 = dma.done.wait [#allocation5], 4096  }
  0x4b   :  { %547 = vsyncadd [#allocation5], 4294963200 }
  0x4c   :  { %431 = vsyncpa [#allocation5], 1 }
  0x4d   :  { %432 = vsyncmov [#allocation3] }
  0x50   :  { %s433_s8 = vpop.sfrf %432 }
  0x51   :  { %p512_p8 = scmp.ne.s32.totalorder %s433_s8, 0 }
  0x53   :  { %437 = shalt.err (%p512_p8)  }
  0x54   :  { %439 = vsyncmov [#allocation3 + $0x1] }
  0x57   :  { %s440_s9 = vpop.sfrf %439 }
  0x58   :  { %p513_p9 = scmp.ne.s32.totalorder %s440_s9, 0 }
  0x5a   :  { %444 = shalt.err (%p513_p9)  }
  0x5b   :  { %446 = vsyncmov [#allocation3 + $0x2] }
  0x5e   :  { %s447_s10 = vpop.sfrf %446 }
  0x5f   :  { %p514_p10 = scmp.ne.s32.totalorder %s447_s10, 0 }
  0x61   :  { %451 = shalt.err (%p514_p10)  }

</bundles_post_ra>
